<compile_context>
chip_gen: v5e
topology: v5e:2x2
jax: 0.10.0
libtpu: 0.0.40
codegen_flags: <defaults>
</compile_context>

<pallas_src>
import math

import jax
import jax.numpy as jnp
from jax.experimental import pallas as pl
from jax.experimental.pallas import tpu as pltpu


def _pe_add_kernel(x_ref, pe_ref, o_ref):
    # x_ref / o_ref block: (TS, B, D); pe_ref block: (TS, 1, D).
    # Broadcast of pe over the batch (sublane) axis happens in the VPU add.
    o_ref[...] = x_ref[...] + pe_ref[...]


def make_positional_encoding_table(d_model: int,
                                   max_len: int = 5000,
                                   dtype=jnp.float32) -> jax.Array:
    """Replicates the PyTorch register_buffer 'pe': shape (max_len, 1, d_model)."""
    position = jnp.arange(max_len, dtype=jnp.float32)[:, None]          # (max_len, 1)
    div_term = jnp.exp(
        jnp.arange(d_model, dtype=jnp.float32) * (-math.log(10000.0) / d_model)
    )                                                                    # (d_model,)
    angles = position * div_term                                         # (max_len, d_model)
    pe = jnp.sin(angles) + jnp.cos(angles)
    return pe[:, None, :].astype(dtype)                                  # (max_len, 1, d_model)


def _choose_seq_tile(S: int, B: int, D: int, itemsize: int) -> int:
    """~2 MiB per x block; multiple of 8 on the sequence axis unless we take it whole."""
    target_bytes = 2 << 20
    ts = max(1, target_bytes // max(1, B * D * itemsize))
    if ts >= S:
        return S
    ts = max(8, (ts // 8) * 8)
    return min(ts, S)


def positional_encoding(x: jax.Array, pe: jax.Array, pos: int = 0) -> jax.Array:
    """x: (seq, batch, d_model); pe: (max_len, 1, d_model); returns x + pe[pos:pos+seq]."""
    S, B, D = x.shape
    assert pe.ndim == 3 and pe.shape[1] == 1 and pe.shape[2] == D, pe.shape
    assert 0 <= pos and pos + S <= pe.shape[0], (pos, S, pe.shape)

    # Slice in the wrapper (free XLA slice) so the kernel never touches unused rows.
    pe_slice = jax.lax.slice_in_dim(pe, pos, pos + S, axis=0).astype(x.dtype)  # (S, 1, D)

    ts = _choose_seq_tile(S, B, D, jnp.dtype(x.dtype).itemsize)
    grid = (pl.cdiv(S, ts),)

    # TODO(synk): nn.Dropout is identity in eval mode; training-mode dropout
    # would need pltpu.prng_seed / pltpu.stateful_bernoulli and is omitted here.
    return pl.pallas_call(
        _pe_add_kernel,
        out_shape=jax.ShapeDtypeStruct((S, B, D), x.dtype),
        grid_spec=pltpu.PrefetchScalarGridSpec(
            num_scalar_prefetch=0,
            grid=grid,
            in_specs=[
                # Last two block dims equal the full (B, D) -> no (8,128) issue,
                # lane-dense stores when D is a multiple of 128.
                pl.BlockSpec((ts, B, D), lambda s: (s, 0, 0)),
                pl.BlockSpec((ts, 1, D), lambda s: (s, 0, 0)),
            ],
            out_specs=pl.BlockSpec((ts, B, D), lambda s: (s, 0, 0)),
        ),
        compiler_params=pltpu.CompilerParams(
            dimension_semantics=("parallel",),
        ),
    )(x, pe_slice)


if __name__ == "__main__":
    key = jax.random.PRNGKey(0)

    seq_len, batch, d_model = 8, 2, 32
    max_len = 64

    x = jax.random.normal(key, (seq_len, batch, d_model), dtype=jnp.float32)
    pe = make_positional_encoding_table(d_model, max_len=max_len, dtype=jnp.float32)

    # pos = 0 (default) and a nonzero offset, both checked against plain JAX.
    y0 = jax.block_until_ready(positional_encoding(x, pe, pos=0))
    y3 = jax.block_until_ready(positional_encoding(x, pe, pos=3))

    ref0 = x + pe[0:seq_len]
    ref3 = x + pe[3:3 + seq_len]

    assert y0.shape == x.shape and y3.shape == x.shape
    assert jnp.allclose(y0, ref0, atol=1e-6, rtol=1e-6), "pos=0 mismatch"
    assert jnp.allclose(y3, ref3, atol=1e-6, rtol=1e-6), "pos=3 mismatch"

    print("KERNEL_OK")
</pallas_src>

<mosaic_0001>
module attributes {stable_mosaic.version = 11 : i64} {
  func.func @_pe_add_kernel(%arg0: i32, %arg1: memref<8x2x32xf32, #tpu.memory_space<vmem>>, %arg2: memref<8x1x32xf32, #tpu.memory_space<vmem>>, %arg3: memref<8x2x32xf32, #tpu.memory_space<vmem>>) attributes {dimension_semantics = [#tpu.dimension_semantics<parallel>], iteration_bounds = array<i64: 1>, scalar_prefetch = 0 : i64, scratch_operands = 0 : i64, tpu.core_type = #tpu.core_type<tc>, window_params = [{transform_indices = @transform_0, window_bounds = array<i64: 8, 2, 32>}, {transform_indices = @transform_1, window_bounds = array<i64: 8, 1, 32>}, {transform_indices = @transform_2, window_bounds = array<i64: 8, 2, 32>}]} {
    %c0 = arith.constant 0 : index
    %c0_0 = arith.constant 0 : index
    %c0_1 = arith.constant 0 : index
    %0 = vector.load %arg1[%c0, %c0_0, %c0_1] : memref<8x2x32xf32, #tpu.memory_space<vmem>>, vector<8x2x32xf32>
    %c0_2 = arith.constant 0 : index
    %c0_3 = arith.constant 0 : index
    %c0_4 = arith.constant 0 : index
    %1 = vector.load %arg2[%c0_2, %c0_3, %c0_4] : memref<8x1x32xf32, #tpu.memory_space<vmem>>, vector<8x1x32xf32>
    %2 = vector.broadcast %1 : vector<8x1x32xf32> to vector<8x2x32xf32>
    %3 = arith.addf %0, %2 : vector<8x2x32xf32>
    %c0_5 = arith.constant 0 : index
    %c0_6 = arith.constant 0 : index
    %c0_7 = arith.constant 0 : index
    %4 = vector.load %arg3[%c0_5, %c0_6, %c0_7] : memref<8x2x32xf32, #tpu.memory_space<vmem>>, vector<8x2x32xf32>
    tpu.vector_store %arg3[%c0_5, %c0_6, %c0_7], %3 {strides = array<i32>} : memref<8x2x32xf32, #tpu.memory_space<vmem>>, vector<8x2x32xf32>,
    return
  }
  func.func @transform_0(%arg0: i32) -> (i32, i32, i32) {
    %c0_i32 = arith.constant 0 : i32
    %c0_i32_0 = arith.constant 0 : i32
    %c0_i32_1 = arith.constant 0 : i32
    return %arg0, %c0_i32, %c0_i32_0 : i32, i32, i32
  }
  func.func @transform_1(%arg0: i32) -> (i32, i32, i32) {
    %c0_i32 = arith.constant 0 : i32
    %c0_i32_0 = arith.constant 0 : i32
    %c0_i32_1 = arith.constant 0 : i32
    return %arg0, %c0_i32, %c0_i32_0 : i32, i32, i32
  }
  func.func @transform_2(%arg0: i32) -> (i32, i32, i32) {
    %c0_i32 = arith.constant 0 : i32
    %c0_i32_0 = arith.constant 0 : i32
    %c0_i32_1 = arith.constant 0 : i32
    return %arg0, %c0_i32, %c0_i32_0 : i32, i32, i32
  }
}

</mosaic_0001>

<bundles_post_ra>
// kernel: tpu_custom_call.1
= control target key start
LH: loop header
LB: loop body
LE: loop exit
PB: predicated region body
PF: predicated region fallthrough
CT: control target
= control target key end

     0   :  { %7 = vsyncpa [#allocation3], 0  ;;  %s266_s0 = inlined_call_operand.hbm [shape: f32[8,2,32], index: 0, kind: input, shape index: {}]   ;;  %s267_s1 = inlined_call_operand.hbm [shape: f32[8,1,32], index: 1, kind: input, shape index: {}]   ;;  %s268_s2 = inlined_call_operand.hbm [shape: f32[8,2,32], index: 2, kind: output, shape index: {}]  }
   0x1   :  { %8 = vsyncpa [#allocation6], 0 }
   0x2   :  { %9 = vsyncpa [#allocation4], 0  ;;  %s14_s11 = sshll.u32 %s266_s0, 4  ;;  %s214_s12 = smov [#allocation2]   ;;  %s15_s11 = int_to_ptr.hbm [resolvable:$true] %s14_s11 }
   0x3   :  { %s16_s13 = sshll.u32 %s214_s12, 4  ;;  %s27_s16 = sshll.u32 %s267_s1, 4  ;;  %s17_s13 = int_to_ptr.vmem [resolvable:$true] %s16_s13  ;;  %s28_s16 = int_to_ptr.hbm [resolvable:$true] %s27_s16 }
   0x4   :  { %s215_s17 = smov 32   ;;  %s216_s18 = smov 2  }
   0x5   :  { %22 = dma.hbm_to_vmem [thread:$0]  %s15_s11, 256, %s17_s13, [#allocation3], %s215_s17, %s215_s17, %s216_s18  }
   0x6   :  { %s217_s19 = smov [#allocation5]   ;;  %s218_s21 = smov 16  }
   0x7   :  { %s29_s20 = sshll.u32 %s217_s19, 4  ;;  %s219_s0 = smov 1   ;;  %s30_s20 = int_to_ptr.vmem [resolvable:$true] %s29_s20 }
   0x8   :  { %35 = dma.hbm_to_vmem [thread:$0]  %s28_s16, 128, %s30_s20, [#allocation6], %s218_s21, %s218_s21, %s219_s0  }
   0x9   :  { %208 = dma.done.wait [#allocation3], 256  }
   0xa   :  { %209 = vsyncadd [#allocation3], 4294967040 }
   0xb   :  { %210 = dma.done.wait [#allocation6], 128  }
   0xc   :  { %211 = vsyncadd [#allocation6], 4294967168  ;;  %vm92_vm0 = vcmask 254976   ;;  %s220_s22 = smov [#allocation7]   ;;  %s107_s25 = sshll.u32 %s268_s2, 4  ;;  %s108_s25 = int_to_ptr.hbm [resolvable:$true] %s107_s25 }
   0xd   :  { %s245_s1 = sshll.u32 %s220_s22, 4  ;;  %v44_v0 = vld [vmem:[#allocation2] sm:$0x3]  ;;  %v128_v1 = vld [vmem:[#allocation5] ss:$0 sm:$0xff]  ;;  %s106_s1 = int_to_ptr.vmem [resolvable:$true] %s245_s1 }
   0xe   :  { %v45_v2 = vld [vmem:[#allocation2 + $0x2] sm:$0x3]  ;;  %v129_v3 = vld [vmem:[#allocation5 + $0x1] ss:$0 sm:$0xff]  ;;  %v84_v4 = vadd.f32 %v128_v1, %v44_v0  ;;  %v46_v5 = vld [vmem:[#allocation2 + $0x4] sm:$0x3] }
   0xf   :  { %v130_v6 = vld [vmem:[#allocation5 + $0x2] ss:$0 sm:$0xff]  ;;  %v85_v7 = vadd.f32 %v129_v3, %v45_v2  ;;  %v47_v8 = vld [vmem:[#allocation2 + $0x6] sm:$0x3]  ;;  %v131_v9 = vld [vmem:[#allocation5 + $0x3] ss:$0 sm:$0xff] }
  0x10   :  { %93 = vst.msk [vmem:[#allocation7] sm:$0x3] %vm92_vm0, %v84_v4  ;;  %v86_v10 = vadd.f32 %v130_v6, %v46_v5  ;;  %v48_v11 = vld [vmem:[#allocation2 + $0x8] sm:$0x3]  ;;  %v87_v12 = vadd.f32 %v131_v9, %v47_v8  ;;  %v132_v13 = vld [vmem:[#allocation5 + $0x4] ss:$0 sm:$0xff] }
  0x11   :  { %94 = vst.msk [vmem:[#allocation7 + $0x2] sm:$0x3] %vm92_vm0, %v85_v7  ;;  %v49_v14 = vld [vmem:[#allocation2 + $0xa] sm:$0x3]  ;;  %v133_v15 = vld [vmem:[#allocation5 + $0x5] ss:$0 sm:$0xff]  ;;  %v88_v16 = vadd.f32 %v132_v13, %v48_v11 }
  0x12   :  { %95 = vst.msk [vmem:[#allocation7 + $0x4] sm:$0x3] %vm92_vm0, %v86_v10  ;;  %v50_v17 = vld [vmem:[#allocation2 + $0xc] sm:$0x3]  ;;  %v89_v18 = vadd.f32 %v133_v15, %v49_v14  ;;  %v134_v19 = vld [vmem:[#allocation5 + $0x6] ss:$0 sm:$0xff] }
  0x13   :  { %96 = vst.msk [vmem:[#allocation7 + $0x6] sm:$0x3] %vm92_vm0, %v87_v12  ;;  %v51_v20 = vld [vmem:[#allocation2 + $0xe] sm:$0x3]  ;;  %v135_v21 = vld [vmem:[#allocation5 + $0x7] ss:$0 sm:$0xff]  ;;  %v90_v22 = vadd.f32 %v134_v19, %v50_v17 }
  0x14   :  { %97 = vst.msk [vmem:[#allocation7 + $0x8] sm:$0x3] %vm92_vm0, %v88_v16  ;;  %v91_v23 = vadd.f32 %v135_v21, %v51_v20 }
  0x15   :  { %98 = vst.msk [vmem:[#allocation7 + $0xa] sm:$0x3] %vm92_vm0, %v89_v18 }
  0x16   :  { %99 = vst.msk [vmem:[#allocation7 + $0xc] sm:$0x3] %vm92_vm0, %v90_v22 }
  0x17   :  { %100 = vst.msk [vmem:[#allocation7 + $0xe] sm:$0x3] %vm92_vm0, %v91_v23 }
  0x18   :  { %113 = dma.vmem_to_hbm [thread:$0]  %s106_s1, 256, %s108_s25, [#allocation4], %s215_s17, %s215_s17, %s216_s18  }
  0x19   :  { %212 = dma.done.wait [#allocation4], 256  }
  0x1a   :  { %213 = vsyncadd [#allocation4], 4294967040 }
  0x1b   :  { %118 = vsyncpa [#allocation3], 1 }
  0x1c   :  { %119 = vsyncpa [#allocation6], 1 }
  0x1d   :  { %120 = vsyncpa [#allocation4], 1 }

</bundles_post_ra>
